<compile_context>
chip_gen: v7x
topology: tpu7x:2x2x1
jax: 0.10.0
libtpu: 0.0.40
codegen_flags: <defaults>
</compile_context>

<pallas_src>
import functools
import math

import jax
import jax.numpy as jnp
from jax import lax
from jax.experimental import pallas as pl
from jax.experimental.pallas import tpu as pltpu


def _round_up(x, m):
    return ((x + m - 1) // m) * m


def _cdiv(a, b):
    return (a + b - 1) // b


_VMEM_TILE_BUDGET = 40 * 1024 * 1024   # tile sizing budget (v7x-safe, 64 MiB phys)
_VMEM_LIMIT_CAP = 56 * 1024 * 1024     # never ask the compiler for more than this


# --------------------------------------------------------------------------
# Kernels
# --------------------------------------------------------------------------

def _head_kernel_resident(x_ref, w_ref, b_ref, o_ref):
    # x: (TILE_B, D) streamed, w: (D, K_pad) resident (constant index_map ->
    # DMA'd once), b: (1, K_pad), o: (TILE_B, K_pad) f32.
    logits = jnp.dot(x_ref[...], w_ref[...], preferred_element_type=jnp.float32)
    logits = logits + b_ref[...]
    m = jnp.max(logits, axis=-1, keepdims=True)
    # Fused LSE: out = logits - (m + log(sum(exp(logits - m))))
    lse = m + jnp.log(jnp.sum(jnp.exp(logits - m), axis=-1, keepdims=True))
    o_ref[...] = (logits - lse).astype(o_ref.dtype)


def _head_kernel_reduce(x_ref, w_ref, b_ref, o_ref, *, tile_d, d_rem):
    # Large-D fallback. x: (TILE_B, TILE_D), w: (TILE_D, K_pad), b: (1, K_pad),
    # o: (TILE_B, K_pad) f32, resident across the D (k) axis and used directly
    # as the accumulator (no extra VMEM scratch).
    k = pl.program_id(1)
    num_k = pl.num_programs(1)

    x = x_ref[...]
    if d_rem:  # static: last D tile of x is partial -> zero the stale columns
        col = lax.broadcasted_iota(jnp.int32, x.shape, 1)
        limit = jnp.where(k == num_k - 1, d_rem, tile_d)
        x = jnp.where(col < limit, x, 0).astype(x_ref.dtype)

    contrib = jnp.dot(x, w_ref[...], preferred_element_type=jnp.float32)

    @pl.when(k == 0)
    def _():
        o_ref[...] = contrib + b_ref[...]     # bias folded into the init step

    @pl.when(k > 0)
    def _():
        o_ref[...] += contrib

    @pl.when(k == num_k - 1)
    def _():
        logits = o_ref[...]
        m = jnp.max(logits, axis=-1, keepdims=True)
        lse = m + jnp.log(jnp.sum(jnp.exp(logits - m), axis=-1, keepdims=True))
        o_ref[...] = logits - lse


# --------------------------------------------------------------------------
# Wrapper
# --------------------------------------------------------------------------

def categorical_head(x, w, b, *, compute_dtype=None, tile_b=1024, tile_d=2048,
                     force_reduction=False):
    """CategoricalHead forward: log_softmax(x @ w + b, axis=-1).

    x: (B, D) activations, w: (D, K) weight (transpose of nn.Linear layout),
    b: (K,) bias. Returns (B, K) float32 normalized log-probabilities.
    """
    B, D = x.shape
    K = w.shape[1]

    # bf16 compute only if activations already arrive in bf16 (or explicitly
    # requested); accumulation + softmax stay f32 everywhere.
    if compute_dtype is None:
        compute_dtype = jnp.bfloat16 if x.dtype == jnp.bfloat16 else jnp.float32
    compute_dtype = jnp.dtype(compute_dtype)
    if x.dtype != compute_dtype:
        x = x.astype(compute_dtype)   # extra pass only when the caller forces it
    if w.dtype != compute_dtype:
        w = w.astype(compute_dtype)
    x_item = compute_dtype.itemsize
    w_item = compute_dtype.itemsize

    # Lane-dense output / weight columns (multiple of 128; NOT widened to 256).
    K_pad = _round_up(K, 128)

    # Minimal batch padding: at most 7 rows, only if B is not sublane-aligned.
    B8 = _round_up(B, 8)
    if B8 != B:
        x = jnp.zeros((B8, D), x.dtype).at[:B].set(x)

    align = 16 if (compute_dtype == jnp.bfloat16 and B8 >= 16) else 8

    def _pick_tile_b(tb_max):
        tb_max = max(align, (tb_max // align) * align)
        target = max(align, min(tile_b, tb_max))
        nb = max(1, _cdiv(B8, target))
        if B8 >= 2 * align:
            nb = max(nb, 2)            # >=2 batch tiles -> both v7x TensorCores
        tb = min(_round_up(_cdiv(B8, nb), align), B8)
        return tb, _cdiv(B8, tb)

    # Bias with -1e30 sentinel in padded columns: they can never win the row
    # max nor contribute to the softmax sum (exp underflows cleanly to 0).
    b_p = jnp.full((1, K_pad), -1e30, dtype=jnp.float32).at[0, :K].set(
        b.astype(jnp.float32))

    w_bytes = D * K_pad * w_item
    min_fit = 2 * w_bytes + 2 * align * D * x_item + 2 * align * K_pad * 4
    use_resident = (not force_reduction) and (min_fit <= _VMEM_TILE_BUDGET)

    if use_resident:
        # ---------------- resident-weight fast path (normal case) ------------
        per_row = 2 * D * x_item + 2 * K_pad * 4
        TILE_B, nb = _pick_tile_b((_VMEM_TILE_BUDGET - 2 * w_bytes) // per_row)

        w_p = jnp.zeros((D, K_pad), w.dtype).at[:, :K].set(w) if K_pad != K else w

        est_vmem = (2 * TILE_B * D * x_item + 2 * w_bytes
                    + 2 * TILE_B * K_pad * 4 + 2 * K_pad * 4)
        vmem_limit = min(max(int(est_vmem * 1.3) + (1 << 20), 32 * 1024 * 1024),
                         _VMEM_LIMIT_CAP)

        cost = pl.CostEstimate(
            flops=2 * B8 * D * K_pad,
            transcendentals=B8 * (K_pad + 1),
            bytes_accessed=(B8 * D * x_item + w_bytes + K_pad * 4
                            + B8 * K_pad * 4),   # W streamed exactly once
        )

        out = pl.pallas_call(
            _head_kernel_resident,
            out_shape=jax.ShapeDtypeStruct((B8, K_pad), jnp.float32),
            grid=(nb,),
            in_specs=[
                pl.BlockSpec((TILE_B, D), lambda i: (i, 0)),   # x tiles (streamed)
                pl.BlockSpec((D, K_pad), lambda i: (0, 0)),    # W resident
                pl.BlockSpec((1, K_pad), lambda i: (0, 0)),    # bias resident
            ],
            out_specs=pl.BlockSpec((TILE_B, K_pad), lambda i: (i, 0)),
            compiler_params=pltpu.CompilerParams(
                dimension_semantics=("parallel",),
                vmem_limit_bytes=vmem_limit,
            ),
            cost_estimate=cost,
        )(x, w_p, b_p)
    else:
        # ---------------- large-D fallback: D reduction grid axis ------------
        TILE_D = max(128, (min(tile_d, _round_up(D, 128)) // 128) * 128)
        nd = _cdiv(D, TILE_D)
        D_pad = nd * TILE_D
        d_rem = D % TILE_D            # static; 0 => no in-kernel masking needed

        w_slab_bytes = 2 * TILE_D * K_pad * w_item
        per_row = 2 * TILE_D * x_item + 2 * K_pad * 4
        TILE_B, nb = _pick_tile_b((_VMEM_TILE_BUDGET - w_slab_bytes) // per_row)

        # Pad W only (tiny): zeros along D, zeros along K (bias sentinel keeps
        # padded K columns out of the softmax).
        if (D_pad, K_pad) != (D, K):
            w_p = jnp.zeros((D_pad, K_pad), w.dtype).at[:D, :K].set(w)
        else:
            w_p = w

        est_vmem = (2 * TILE_B * TILE_D * x_item + w_slab_bytes
                    + 2 * TILE_B * K_pad * 4 + 2 * K_pad * 4)
        vmem_limit = min(max(int(est_vmem * 1.3) + (1 << 20), 32 * 1024 * 1024),
                         _VMEM_LIMIT_CAP)

        cost = pl.CostEstimate(
            flops=2 * B8 * D_pad * K_pad,
            transcendentals=B8 * (K_pad + 1),
            bytes_accessed=(B8 * D * x_item + nb * D_pad * K_pad * w_item
                            + K_pad * 4 + B8 * K_pad * 4),
        )

        kernel = functools.partial(_head_kernel_reduce, tile_d=TILE_D, d_rem=d_rem)
        out = pl.pallas_call(
            kernel,
            out_shape=jax.ShapeDtypeStruct((B8, K_pad), jnp.float32),
            grid=(nb, nd),
            in_specs=[
                pl.BlockSpec((TILE_B, TILE_D), lambda i, k: (i, k)),  # x
                pl.BlockSpec((TILE_D, K_pad), lambda i, k: (k, 0)),   # W slab
                pl.BlockSpec((1, K_pad), lambda i, k: (0, 0)),        # bias
            ],
            out_specs=pl.BlockSpec((TILE_B, K_pad), lambda i, k: (i, 0)),
            compiler_params=pltpu.CompilerParams(
                dimension_semantics=("parallel", "arbitrary"),
                vmem_limit_bytes=vmem_limit,
            ),
            cost_estimate=cost,
        )(x, w_p, b_p)

    if (B8, K_pad) != (B, K):
        out = out[:B, :K]
    return out


class CategoricalDist:
    """Minimal stand-in for the PyTorch CategoricalDist (built from normalized logits)."""

    def __init__(self, logits):
        self.logits = logits            # (B, K), already log-probs
        self.probs = jnp.exp(logits)

    def log_prob(self, x):
        x = x.astype(jnp.int32)
        return jnp.take_along_axis(self.logits, x[..., None], axis=-1)[..., 0]

    def kl(self, other):
        a0 = self.logits - jnp.max(self.logits, axis=-1, keepdims=True)
        a1 = other.logits - jnp.max(other.logits, axis=-1, keepdims=True)
        ea0, ea1 = jnp.exp(a0), jnp.exp(a1)
        z0 = jnp.sum(ea0, axis=-1, keepdims=True)
        z1 = jnp.sum(ea1, axis=-1, keepdims=True)
        p0 = ea0 / z0
        return jnp.sum(p0 * (a0 - jnp.log(z0) - a1 + jnp.log(z1)), axis=-1)


def categorical_head_forward(x, w, b, **kwargs):
    return CategoricalDist(categorical_head(x, w, b, **kwargs))


if __name__ == "__main__":
    # Small, deterministic problem matching the module: batch=8, input=32, out=16.
    B, D, K = 8, 32, 16
    key = jax.random.PRNGKey(0)
    kx, kw, kb = jax.random.split(key, 3)

    x = jax.random.normal(kx, (B, D), dtype=jnp.float32)
    bound = 1.0 / math.sqrt(D)
    w = jax.random.uniform(kw, (D, K), minval=-bound, maxval=bound,
                           dtype=jnp.float32)
    b = jax.random.uniform(kb, (K,), minval=-bound, maxval=bound,
                           dtype=jnp.float32)

    ref = jax.nn.log_softmax(x @ w + b, axis=-1)

    # 1) f32 resident-weight fast path (tight tolerance).
    dist = categorical_head_forward(x, w, b)
    out = jax.block_until_ready(dist.logits)
    assert out.shape == (B, K)
    assert jnp.allclose(out, ref, atol=1e-5, rtol=1e-5)

    # 2) bf16 compute path (f32 accumulation + f32 softmax), relaxed tolerance.
    out_bf16 = jax.block_until_ready(
        categorical_head(x, w, b, compute_dtype=jnp.bfloat16))
    assert jnp.allclose(out_bf16, ref, atol=3e-2, rtol=3e-2)

    # 3) Large-D fallback: D reduction axis, accumulation into the resident
    #    output block, in-kernel masking of the partial last D tile (300 % 128),
    #    batch tiling, K padding (K_pad=128) with lane-dense stores.
    B2, D2, K2 = 24, 300, 20
    k2x, k2w, k2b = jax.random.split(jax.random.PRNGKey(1), 3)
    x2 = jax.random.normal(k2x, (B2, D2), dtype=jnp.float32)
    bound2 = 1.0 / math.sqrt(D2)
    w2 = jax.random.uniform(k2w, (D2, K2), minval=-bound2, maxval=bound2,
                            dtype=jnp.float32)
    b2 = jax.random.uniform(k2b, (K2,), minval=-bound2, maxval=bound2,
                            dtype=jnp.float32)
    ref2 = jax.nn.log_softmax(x2 @ w2 + b2, axis=-1)
    out2 = jax.block_until_ready(
        categorical_head(x2, w2, b2, tile_b=8, tile_d=128, force_reduction=True))
    assert out2.shape == (B2, K2)
    assert jnp.allclose(out2, ref2, atol=1e-4, rtol=1e-4)

    # 4) Ragged batch (B not a multiple of 8): minimal sublane padding + >=2
    #    batch tiles, resident-weight path.
    B3, D3, K3 = 13, 64, 5
    k3x, k3w, k3b = jax.random.split(jax.random.PRNGKey(2), 3)
    x3 = jax.random.normal(k3x, (B3, D3), dtype=jnp.float32)
    bound3 = 1.0 / math.sqrt(D3)
    w3 = jax.random.uniform(k3w, (D3, K3), minval=-bound3, maxval=bound3,
                            dtype=jnp.float32)
    b3 = jax.random.uniform(k3b, (K3,), minval=-bound3, maxval=bound3,
                            dtype=jnp.float32)
    ref3 = jax.nn.log_softmax(x3 @ w3 + b3, axis=-1)
    out3 = jax.block_until_ready(categorical_head(x3, w3, b3))
    assert out3.shape == (B3, K3)
    assert jnp.allclose(out3, ref3, atol=1e-5, rtol=1e-5)

    print("KERNEL_OK")
</pallas_src>

<mosaic_0001>
module attributes {stable_mosaic.version = 11 : i64} {
  func.func @_head_kernel_resident(%arg0: i32, %arg1: memref<8x32xf32, #tpu.memory_space<vmem>>, %arg2: memref<32x128xf32, #tpu.memory_space<vmem>>, %arg3: memref<1x128xf32, #tpu.memory_space<vmem>>, %arg4: memref<8x128xf32, #tpu.memory_space<vmem>>) attributes {dimension_semantics = [#tpu.dimension_semantics<parallel>], iteration_bounds = array<i64: 1>, scalar_prefetch = 0 : i64, scratch_operands = 0 : i64, tpu.core_type = #tpu.core_type<tc>, window_params = [{transform_indices = @transform_0, window_bounds = array<i64: 8, 32>}, {pipeline_mode = #tpu.pipeline_mode<synchronous>, transform_indices = @transform_1, window_bounds = array<i64: 32, 128>}, {pipeline_mode = #tpu.pipeline_mode<synchronous>, transform_indices = @transform_2, window_bounds = array<i64: 1, 128>}, {transform_indices = @transform_3, window_bounds = array<i64: 8, 128>}]} {
    %c0 = arith.constant 0 : index
    %c0_0 = arith.constant 0 : index
    %0 = vector.load %arg1[%c0, %c0_0] : memref<8x32xf32, #tpu.memory_space<vmem>>, vector<8x32xf32>
    %c0_1 = arith.constant 0 : index
    %c0_2 = arith.constant 0 : index
    %1 = vector.load %arg2[%c0_1, %c0_2] : memref<32x128xf32, #tpu.memory_space<vmem>>, vector<32x128xf32>
    %cst = arith.constant dense<0.000000e+00> : vector<8x128xf32>
    %2 = tpu.matmul %0, %1, %cst {dimension_numbers = #tpu.dot_dimension_numbers<[1], [0], [0], [1], [0, 0, 1, 1], [], []>} : vector<8x32xf32>, vector<32x128xf32>, vector<8x128xf32> -> vector<8x128xf32>
    %c0_3 = arith.constant 0 : index
    %c0_4 = arith.constant 0 : index
    %3 = vector.load %arg3[%c0_3, %c0_4] : memref<1x128xf32, #tpu.memory_space<vmem>>, vector<1x128xf32>
    %4 = vector.broadcast %3 : vector<1x128xf32> to vector<8x128xf32>
    %5 = arith.addf %2, %4 : vector<8x128xf32>
    %cst_5 = arith.constant dense<0xFF800000> : vector<8xf32>
    %6 = vector.multi_reduction <maximumf>, %5, %cst_5 [1] : vector<8x128xf32> to vector<8xf32>
    %7 = vector.shape_cast %6 : vector<8xf32> to vector<8x1xf32>
    %8 = vector.broadcast %7 : vector<8x1xf32> to vector<8x128xf32>
    %9 = arith.subf %5, %8 : vector<8x128xf32>
    %10 = math.exp %9 : vector<8x128xf32>
    %cst_6 = arith.constant dense<0.000000e+00> : vector<8xf32>
    %11 = vector.multi_reduction <add>, %10, %cst_6 [1] : vector<8x128xf32> to vector<8xf32>
    %12 = vector.shape_cast %11 : vector<8xf32> to vector<8x1xf32>
    %13 = math.log %12 : vector<8x1xf32>
    %14 = arith.addf %7, %13 : vector<8x1xf32>
    %15 = vector.broadcast %14 : vector<8x1xf32> to vector<8x128xf32>
    %16 = arith.subf %5, %15 : vector<8x128xf32>
    %c0_7 = arith.constant 0 : index
    %c0_8 = arith.constant 0 : index
    %17 = vector.load %arg4[%c0_7, %c0_8] : memref<8x128xf32, #tpu.memory_space<vmem>>, vector<8x128xf32>
    tpu.vector_store %arg4[%c0_7, %c0_8], %16 {strides = array<i32>} : memref<8x128xf32, #tpu.memory_space<vmem>>, vector<8x128xf32>,
    return
  }
  func.func @transform_0(%arg0: i32) -> (i32, i32) {
    %c0_i32 = arith.constant 0 : i32
    %c0_i32_0 = arith.constant 0 : i32
    return %arg0, %c0_i32 : i32, i32
  }
  func.func @transform_1(%arg0: i32) -> (i32, i32) {
    %c0_i32 = arith.constant 0 : i32
    %c0_i32_0 = arith.constant 0 : i32
    %c0_i32_1 = arith.constant 0 : i32
    return %c0_i32, %c0_i32_0 : i32, i32
  }
  func.func @transform_2(%arg0: i32) -> (i32, i32) {
    %c0_i32 = arith.constant 0 : i32
    %c0_i32_0 = arith.constant 0 : i32
    %c0_i32_1 = arith.constant 0 : i32
    return %c0_i32, %c0_i32_0 : i32, i32
  }
  func.func @transform_3(%arg0: i32) -> (i32, i32) {
    %c0_i32 = arith.constant 0 : i32
    %c0_i32_0 = arith.constant 0 : i32
    return %arg0, %c0_i32 : i32, i32
  }
}

</mosaic_0001>

<bundles_post_ra>
// kernel: tpu_custom_call.1
= control target key start
LH: loop header
LB: loop body
LE: loop exit
PB: predicated region body
PF: predicated region fallthrough
CT: control target
= control target key end

     0   :  { %8 = vsyncpa [#allocation3], 0  ;;  %s337_s0 = inlined_call_operand.hbm [shape: f32[8,32], index: 0, kind: input, shape index: {}]   ;;  %s338_s1 = inlined_call_operand.hbm [shape: f32[32,128], index: 1, kind: input, shape index: {}]   ;;  %s339_s2 = inlined_call_operand.vmem [shape: f32[1,128], index: 2, kind: input, shape index: {}]   ;;  %s340_s3 = inlined_call_operand.hbm [shape: f32[8,128], index: 3, kind: output, shape index: {}]  }
   0x1   :  { %9 = vsyncpa [#allocation6], 0 }
   0x2   :  { %10 = vsyncpa [#allocation4], 0  ;;  %s263_s12 = smov [#allocation2]   ;;  %s264_s14 = smov [#allocation5]  }
   0x3   :  { %s17_s13 = sshll.u32 %s263_s12, 4  ;;  %s26_s15 = sshll.u32 %s264_s14, 4  ;;  %s18_s13 = int_to_ptr.vmem [resolvable:$true] %s17_s13  ;;  %s291_s15 = int_to_ptr.vmem [resolvable:$true] %s26_s15 }
   0x4   :  { %s191_s18 = scalar_lea.hbm %s337_s0, 128 }
   0x5   :  { %p192_p0 = scmp.ne.s32.totalorder %s337_s0, %s191_s18  ;;  %p195_p1 = scmp.lt.u32.totalorder %s191_s18, %s337_s0 }
   0x7   :  { %p197_p2 = pnand %p195_p1, %p192_p0 }
   0x9   :  { %200 = shalt.err (!%p197_p2)
}
   0xa   :  { %s201_s23 = scalar_lea.vmem %s18_s13, 128  ;;  %p206_p4 = scmp.lt.s32.totalorder %s18_s13, %s18_s13 }
   0xb   :  { %p202_p3 = scmp.ne.s32.totalorder %s18_s13, %s201_s23  ;;  %p207_p5 = scmp.lt.s32.totalorder %s201_s23, %s201_s23 }
   0xd   :  { %p208_p6 = por %p207_p5, %p206_p4 }
   0xf   :  { %p209_p7 = pnand %p208_p6, %p202_p3 }
  0x11   :  { %212 = shalt.err (!%p209_p7)
}
  0x12   :  { %20 = dma.hbm_to_vmem [thread:$0]  %s337_s0, 128, %s18_s13, [#allocation3]  }
  0x13   :  { %s213_s28 = scalar_lea.hbm %s338_s1, 512 }
  0x14   :  { %p214_p8 = scmp.ne.s32.totalorder %s338_s1, %s213_s28  ;;  %p217_p9 = scmp.lt.u32.totalorder %s213_s28, %s338_s1 }
  0x16   :  { %p219_p10 = pnand %p217_p9, %p214_p8 }
  0x18   :  { %222 = shalt.err (!%p219_p10)
}
  0x19   :  { %s223_s6 = scalar_lea.vmem %s291_s15, 512  ;;  %p228_p12 = scmp.lt.s32.totalorder %s291_s15, %s291_s15 }
  0x1a   :  { %p224_p11 = scmp.ne.s32.totalorder %s291_s15, %s223_s6  ;;  %p229_p13 = scmp.lt.s32.totalorder %s223_s6, %s223_s6 }
  0x1c   :  { %p230_p0 = por %p229_p13, %p228_p12 }
  0x1e   :  { %p231_p1 = pnand %p230_p0, %p224_p11 }
  0x20   :  { %234 = shalt.err (!%p231_p1)
}
  0x21   :  { %s265_s0 = smov 128   ;;  %s266_s7 = smov 8  }
  0x22   :  { %32 = dma.hbm_to_vmem [thread:$0]  %s338_s1, 512, %s291_s15, [#allocation6], %s265_s0, %s265_s0, %s266_s7  }
  0x23   :  { %257 = dma.done.wait [#allocation3], 128  }
  0x24   :  { %258 = vsyncadd [#allocation3], 4294967168 }
  0x25   :  { %259 = dma.done.wait [#allocation6], 512  }
  0x26   :  { %260 = vsyncadd [#allocation6], 4294966784  ;;  %v267_v0 = vmov 0.0|0.0   ;;  %vm268_vm0 = vmmov 0   ;;  %v269_v1 = vmov 0.0   ;;  %v42_v2 = vld [vmem:[#allocation5] sm:$0xff] }
  0x27   :  { %173 = vmatprep.subr.bf16.mxu0 %v267_v0  ;;  %170 = vmatprep.mubr.msk.f32.mxu0 %vm268_vm0, %v269_v1  ;;  %v43_v3 = vld [vmem:[#allocation5 + $0x8] sm:$0xff]  ;;  %v44_v4 = vld [vmem:[#allocation5 + $0x10] sm:$0xff]  ;;  %v45_v6 = vld [vmem:[#allocation5 + $0x18] sm:$0xff]  ;;  %vm53_vm1 = vcmask 261120   ;;  %s270_s11 = smov [#allocation7]  }
  0x28   :  { %v174_v5 = vpack.c.bf16 %v43_v3, %v42_v2  ;;  %v177_v7 = vpack.c.bf16 %v45_v6, %v44_v4  ;;  %v41_v8 = vld [vmem:[#allocation2] sm:$0xff]  ;;  %s145_s12 = sshll.u32 %s270_s11, 4  ;;  %s146_s12 = int_to_ptr.vmem [resolvable:$true] %s145_s12 }
  0x29   :  { %v155_v9 = vld [vmem:[%s339_s2] ss:$0 sm:$0xff]  ;;  %s235_s2 = scalar_lea.vmem %s146_s12, 128  ;;  %p240_p3 = scmp.lt.s32.totalorder %s146_s12, %s146_s12 }
  0x2a   :  { %175 = vmatpush3.bf16.msra.mxu0 %v174_v5  ;;  %p236_p2 = scmp.ne.s32.totalorder %s146_s12, %s235_s2  ;;  %p241_p4 = scmp.lt.s32.totalorder %s235_s2, %s235_s2 }
  0x2b   :  { %176 = vmatprep.subr.bf16.mxu0 %v267_v0 }
  0x2c   :  { %p242_p5 = por %p241_p4, %p240_p3 }
  0x2e   :  { %178 = vmatpush3.bf16.msra.mxu0 %v177_v7  ;;  %p243_p6 = pnand %p242_p5, %p236_p2 }
  0x31   :  { %171 = vmatmul.mubr.msk.f32.vlgmr.msra.gmra.mrb[0].mxu0 %vm53_vm1, %v41_v8 }
 0x104   :  { %v123_v10 = vpop.f32.mrb[0].mxu0 }
 0x105   :  { %v124_v11 = vadd.f32 %v155_v9, %v123_v10  ;;  %v172_v12 = vpop.f32.mrb[1].mxu0 }
 0x107   :  { %127 = vmax.xlane.f32.xlu0 %v124_v11 }
 0x194   :  { %v128_v13 = vpop.xlane.xlu0 %127 }
 0x195   :  { %v129_v14 = vsub.f32 %v124_v11, %v128_v13 }
 0x197   :  { %v130_v15 = vmul.f32 1.442695, %v129_v14 }
 0x199   :  { %187 = vpow2.f32 %v130_v15 }
 0x1a3   :  { %v188_v16 = vpop.eup %187 }
 0x1a4   :  { %132 = vadd.xlane.f32.xlu0 %v188_v16 }
 0x231   :  { %v133_v17 = vpop.xlane.xlu0 %132 }
 0x232   :  { %189 = vlog2.f32 %v133_v17 }
 0x23c   :  { %v190_v18 = vpop.eup %189 }
 0x23d   :  { %v135_v19 = vmul.f32 0.6931472, %v190_v18 }
 0x23f   :  { %v136_v20 = vadd.f32 %v135_v19, %v128_v13 }
 0x241   :  { %v137_v21 = vsub.f32 %v124_v11, %v136_v20 }
 0x243   :  { %138 = vst [vmem:[#allocation7] sm:$0xff] %v137_v21 }
 0x244   :  { %246 = shalt.err (!%p243_p6)
}
 0x245   :  { %s247_s15 = scalar_lea.hbm %s340_s3, 128 }
 0x246   :  { %p248_p7 = scmp.ne.s32.totalorder %s340_s3, %s247_s15  ;;  %p251_p8 = scmp.lt.u32.totalorder %s247_s15, %s340_s3 }
 0x248   :  { %p253_p9 = pnand %p251_p8, %p248_p7 }
 0x24a   :  { %256 = shalt.err (!%p253_p9)
}
 0x24b   :  { %148 = dma.vmem_to_hbm [thread:$0]  %s146_s12, 128, %s340_s3, [#allocation4]  }
 0x24c   :  { %261 = dma.done.wait [#allocation4], 128  }
 0x24d   :  { %262 = vsyncadd [#allocation4], 4294967168 }
 0x24e   :  { %152 = vsyncpa [#allocation3], 1 }
 0x24f   :  { %153 = vsyncpa [#allocation6], 1 }
 0x250   :  { %154 = vsyncpa [#allocation4], 1 }

</bundles_post_ra>
